<compile_context>
chip_gen: v7x
topology: tpu7x:2x2x1
jax: 0.10.0
libtpu: 0.0.40
codegen_flags: <defaults>
</compile_context>

<pallas_src>
import math
from functools import partial

import jax
import jax.numpy as jnp
from jax.experimental import pallas as pl
from jax.experimental.pallas import tpu as pltpu


def _round_up(x, m):
    return (x + m - 1) // m * m


def _conv_act_kernel(x_hbm, w_ref, b_ref, o_ref, x_buf, sem, *,
                     K, Wp, L, L_pad, real_cout, negative_slope,
                     pixel_norm, eps, fold, hint128):
    """One grid step = one (batch element, row strip).

    x_hbm : (N, Cin_p, total_flat)   zero-padded, flattened input in HBM (bf16)
    w_ref : fold  -> (Cout_p, K*K*Cin_p)
            !fold -> (K*K, Cout_p, Cin_p)   WS-scaled conv weights (bf16)
    b_ref : (Cout_p, 1)              bias (f32)
    o_ref : (1, Cout_p, L_pad)       output block (flat, lane-padded strip)
    x_buf : (2, Cin_p, LBUF)         VMEM double buffer for the input strip
    sem   : (2,)                     DMA completion semaphores
    """
    n = pl.program_id(0)
    s = pl.program_id(1)
    n_strips = pl.num_programs(1)
    LBUF = x_buf.shape[2]

    def _src(strip_idx):
        off = strip_idx * L
        if hint128 and not isinstance(off, int):
            off = pl.multiple_of(off, 128)
        return x_hbm.at[n, :, pl.ds(off, LBUF)]

    def _fetch(strip_idx, slot_):
        pltpu.make_async_copy(_src(strip_idx), x_buf.at[slot_], sem.at[slot_]).start()

    slot = s % 2

    # Prime the pipeline at the first strip of every batch element (keeps the
    # DMA chain local to one batch step -> safe with a "parallel" batch axis).
    @pl.when(s == 0)
    def _():
        _fetch(0, 0)

    # Prefetch the next strip while computing on the current one.
    @pl.when(s + 1 < n_strips)
    def _():
        _fetch(s + 1, (s + 1) % 2)

    # Wait for the current strip -- same source slice as the matching start.
    pltpu.make_async_copy(_src(s), x_buf.at[slot], sem.at[slot]).wait()

    xs = x_buf[slot]                                             # (Cin_p, LBUF) bf16

    if fold:
        # Large-Cout path: materialize the implicit-GEMM patch and issue one
        # deep MXU contraction (the patch copies hide under MXU cycles).
        taps = []
        for kh in range(K):
            for kw in range(K):
                a = kh * Wp + kw
                taps.append(xs[:, a:a + L_pad])                  # (Cin_p, L_pad)
        patch = jnp.concatenate(taps, axis=0)                    # (K*K*Cin_p, L_pad)
        acc = jax.lax.dot_general(
            w_ref[...], patch,
            dimension_numbers=(((1,), (0,)), ((), ())),
            preferred_element_type=jnp.float32)                  # (Cout_p, L_pad) f32
    else:
        # Small/medium-Cout path: per-tap accumulation -- no patch buffer, no
        # vst-bound relayout; 9 shallower matmuls accumulated in f32.
        acc = None
        for kh in range(K):
            for kw in range(K):
                a = kh * Wp + kw
                part = jax.lax.dot_general(
                    w_ref[kh * K + kw], xs[:, a:a + L_pad],
                    dimension_numbers=(((1,), (0,)), ((), ())),
                    preferred_element_type=jnp.float32)          # (Cout_p, L_pad)
                acc = part if acc is None else acc + part

    acc = acc + b_ref[...]                                       # bias
    acc = jnp.maximum(acc, negative_slope * acc)                 # LeakyReLU(0.2)

    if pixel_norm:                                               # PixelNorm
        # Padded output channels are exactly zero -> divide by the true count.
        ssq = jnp.sum(acc * acc, axis=0, keepdims=True) * (1.0 / real_cout)
        acc = acc * jax.lax.rsqrt(ssq + eps)

    o_ref[0] = acc.astype(o_ref.dtype)                           # lane-dense store


def _vmem_limit_bytes():
    """Generation-aware scoped-VMEM limit (conservative when unknown)."""
    kind = ""
    try:
        kind = jax.devices()[0].device_kind.lower()
    except Exception:
        pass
    if any(v in kind for v in ("v4", "v5", "v6")):
        return 64 * 1024 * 1024          # 128 MiB physical -> lots of headroom
    return 48 * 1024 * 1024              # v7x has 64 MiB/TC; unknown: stay safe


def _pick_strip_rows(H, W, K, cin_p, cout_p, *, fold, out_bytes, vmem_limit,
                     requested=None):
    """Choose output rows per strip.  TH must divide H; the flat strip length
    is rounded up to a multiple of 128 (L_pad) so stores stay lane-dense."""
    Wp = W + K - 1

    def plan(th):
        L = th * Wp
        L_pad = _round_up(L, 128)
        LBUF = _round_up((K - 1) * Wp + (K - 1) + L_pad, 128)
        foot = (2 * cin_p * LBUF * 2                 # input double buffer (bf16)
                + 2 * cout_p * L_pad * out_bytes     # output double buffer
                + 2 * cout_p * L_pad * 4             # f32 acc + post-op temp
                + 2 * K * K * cin_p * cout_p * 2)    # weights (double buffered)
        if fold:
            foot += K * K * cin_p * L_pad * 2        # materialized patch
        return L, L_pad, LBUF, foot

    if requested is not None:
        th = int(requested)
        if H % th != 0:
            raise ValueError(f"strip_rows={th} must divide H={H}")
        L, L_pad, LBUF, _ = plan(th)
        return th, L, L_pad, LBUF

    budget = int(vmem_limit * 0.6)   # leave headroom for compiler scratch/temps
    for th in sorted((d for d in range(1, H + 1) if H % d == 0), reverse=True):
        L, L_pad, LBUF, foot = plan(th)
        if foot <= budget:
            return th, L, L_pad, LBUF
    L, L_pad, LBUF, _ = plan(1)      # even th=1 over budget: take the smallest
    return 1, L, L_pad, LBUF


def conv_act_forward(x_nchw, mask, batch, weight_oihw, bias, *,
                     negative_slope=0.2, pixel_norm=True, eps=1e-8,
                     strip_rows=None, fold_taps=None, out_dtype=None):
    """Pallas implementation of ConvAct.forward((x, mask, batch))."""
    N, Cin, H, W = x_nchw.shape
    Cout, Cin_w, K, K2 = weight_oihw.shape
    assert Cin_w == Cin and K == K2
    assert K % 2 == 1, "ConvAct uses padding=kernel_size//2 ('same'); odd K assumed"
    pad = K // 2
    Wp = W + 2 * pad
    out_dtype = x_nchw.dtype if out_dtype is None else out_dtype
    out_bytes = jnp.dtype(out_dtype).itemsize

    # Channel layout hygiene: zero-pad channels (padded taps/outputs are exact
    # zeros, so numerics are unchanged).
    Cin_p = _round_up(Cin, 16 if Cin >= 16 else 8)
    Cout_p = _round_up(Cout, 8)

    # Folded single matmul only when Cout is large enough to hide the patch
    # copies under MXU work; per-tap accumulation otherwise (also the better
    # default on v7x's 64 MiB VMEM / MRB accumulation).
    fold = (Cout_p >= 256) if fold_taps is None else bool(fold_taps)

    vmem_limit = _vmem_limit_bytes()
    TH, L, L_pad, LBUF = _pick_strip_rows(
        H, W, K, Cin_p, Cout_p, fold=fold, out_bytes=out_bytes,
        vmem_limit=vmem_limit, requested=strip_rows)
    S = H // TH

    # WSConv2d (equalized lr): runtime weight scale sqrt(2 / fan_in) with the
    # *true* fan-in; padded channels carry zero weight / zero bias.
    fan_in = Cin * K * K
    wt_scale = math.sqrt(2.0 / fan_in)
    w_p = jnp.pad(weight_oihw, ((0, Cout_p - Cout), (0, Cin_p - Cin), (0, 0), (0, 0)))
    if fold:
        w_k = (jnp.transpose(w_p, (0, 2, 3, 1)).reshape(Cout_p, K * K * Cin_p)
               * wt_scale).astype(jnp.bfloat16)
        w_spec = pl.BlockSpec((Cout_p, K * K * Cin_p), lambda n, s: (0, 0))
    else:
        w_k = (jnp.transpose(w_p, (2, 3, 0, 1)).reshape(K * K, Cout_p, Cin_p)
               * wt_scale).astype(jnp.bfloat16)
        w_spec = pl.BlockSpec((K * K, Cout_p, Cin_p), lambda n, s: (0, 0, 0))
    b_k = jnp.pad(bias.astype(jnp.float32), (0, Cout_p - Cout)).reshape(Cout_p, 1)

    # Zero pad: channels -> Cin_p, H/W by `pad`, plus enough extra bottom rows
    # that every strip's LBUF-long halo DMA stays in bounds; cast to bf16 and
    # flatten spatial dims (a free, layout-preserving reshape).
    need = (S - 1) * L + LBUF
    have = (H + K - 1) * Wp
    extra_rows = -(-(need - have) // Wp) if need > have else 0
    x_pad = jnp.pad(x_nchw, ((0, 0), (0, Cin_p - Cin),
                             (pad, pad + extra_rows), (pad, pad)))
    x_flat = x_pad.astype(jnp.bfloat16).reshape(
        N, Cin_p, (H + K - 1 + extra_rows) * Wp)

    kernel = partial(_conv_act_kernel, K=K, Wp=Wp, L=L, L_pad=L_pad,
                     real_cout=Cout, negative_slope=negative_slope,
                     pixel_norm=pixel_norm, eps=eps, fold=fold,
                     hint128=(L % 128 == 0))

    out_flat = pl.pallas_call(
        kernel,
        out_shape=jax.ShapeDtypeStruct((N, Cout_p, S * L_pad), out_dtype),
        grid_spec=pltpu.PrefetchScalarGridSpec(
            num_scalar_prefetch=0,
            grid=(N, S),
            in_specs=[
                pl.BlockSpec(memory_space=pl.ANY),                  # raw HBM input
                w_spec,                                             # weights
                pl.BlockSpec((Cout_p, 1), lambda n, s: (0, 0)),     # bias
            ],
            out_specs=pl.BlockSpec((1, Cout_p, L_pad), lambda n, s: (n, 0, s)),
            scratch_shapes=[
                pltpu.VMEM((2, Cin_p, LBUF), jnp.bfloat16),   # double-buffered strip
                pltpu.SemaphoreType.DMA((2,)),
            ],
        ),
        compiler_params=pltpu.CompilerParams(
            dimension_semantics=("parallel", "arbitrary"),
            vmem_limit_bytes=vmem_limit,
        ),
    )(x_flat, w_k, b_k)

    # Crop channel / lane padding.  The reshapes are free; the slices are the
    # only copies and collapse to a single W-crop when no padding was needed.
    out = out_flat.reshape(N, Cout_p, S, L_pad)[:, :Cout, :, :L]
    out = out.reshape(N, Cout, S, TH, Wp)[..., :W].reshape(N, Cout, H, W)

    # Regular conv ('conv' type): mask and batch pass straight through.
    # TODO(synk): partial-conv ('iconv') mask propagation is not implemented.
    return out, mask, batch


def _reference(x_nchw, weight_oihw, bias, *, negative_slope=0.2, pixel_norm=True, eps=1e-8):
    """Pure-JAX reference matching the kernel numerics (bf16 operands, f32 accum)."""
    Cout, Cin, K, _ = weight_oihw.shape
    fan_in = Cin * K * K
    wt_scale = math.sqrt(2.0 / fan_in)
    w = (weight_oihw * wt_scale).astype(jnp.bfloat16)
    y = jax.lax.conv_general_dilated(
        x_nchw.astype(jnp.bfloat16), w,
        window_strides=(1, 1), padding="SAME",
        dimension_numbers=("NCHW", "OIHW", "NCHW"),
        preferred_element_type=jnp.float32)
    y = y + bias.astype(jnp.float32)[None, :, None, None]
    y = jnp.where(y >= 0, y, negative_slope * y)
    if pixel_norm:
        y = y * jax.lax.rsqrt(jnp.mean(y * y, axis=1, keepdims=True) + eps)
    return y.astype(x_nchw.dtype)


if __name__ == "__main__":
    key = jax.random.PRNGKey(0)
    k_x, k_m, k_w, k_b = jax.random.split(key, 4)

    # --- Test 1: per-tap accumulation path, auto strip sizing -----------------
    N, Cin, H, W = 2, 4, 16, 14
    Cout, K = 8, 3
    x = jax.random.normal(k_x, (N, Cin, H, W), dtype=jnp.float32)
    mask = (jax.random.uniform(k_m, (N, 1, H, W)) > 0.5).astype(jnp.float32)
    batch = jnp.arange(N, dtype=jnp.int32)          # opaque payload, passed through
    weight = jax.random.normal(k_w, (Cout, Cin, K, K), dtype=jnp.float32)
    bias = jax.random.normal(k_b, (Cout,), dtype=jnp.float32) * 0.1

    y, mask_out, batch_out = conv_act_forward(x, mask, batch, weight, bias)
    jax.block_until_ready(y)
    y_ref = _reference(x, weight, bias)
    assert y.shape == (N, Cout, H, W), y.shape
    err = float(jnp.max(jnp.abs(y - y_ref)))
    assert jnp.allclose(y, y_ref, atol=2e-3, rtol=2e-3), \
        f"per-tap path mismatch vs reference (max abs err {err})"
    assert jnp.array_equal(mask_out, mask)
    assert jnp.array_equal(batch_out, batch)

    # --- Test 2: folded path + channel/lane padding + multi-strip -------------
    N2, Cin2, H2, W2 = 1, 5, 16, 13      # Cin->8 pad, Cout->8 pad, L=120->128 pad
    Cout2 = 6
    x2 = jax.random.normal(jax.random.PRNGKey(2), (N2, Cin2, H2, W2), jnp.float32)
    w2 = jax.random.normal(jax.random.PRNGKey(3), (Cout2, Cin2, K, K), jnp.float32)
    b2 = jax.random.normal(jax.random.PRNGKey(4), (Cout2,), jnp.float32) * 0.1
    mask2 = jnp.ones((N2, 1, H2, W2), jnp.float32)
    batch2 = jnp.zeros((N2,), jnp.int32)

    y2, _, _ = conv_act_forward(x2, mask2, batch2, w2, b2,
                                strip_rows=8, fold_taps=True)
    jax.block_until_ready(y2)
    y2_ref = _reference(x2, w2, b2)
    err2 = float(jnp.max(jnp.abs(y2 - y2_ref)))
    assert y2.shape == (N2, Cout2, H2, W2), y2.shape
    assert jnp.allclose(y2, y2_ref, atol=2e-3, rtol=2e-3), \
        f"folded path mismatch vs reference (max abs err {err2})"

    print("KERNEL_OK")
</pallas_src>

<mosaic_0001>
module attributes {stable_mosaic.version = 11 : i64} {
  func.func @_conv_act_kernel(%arg0: i32, %arg1: i32, %arg2: memref<2x8x384xbf16, #tpu.memory_space<any>>, %arg3: memref<9x8x8xbf16, #tpu.memory_space<vmem>>, %arg4: memref<8x1xf32, #tpu.memory_space<vmem>>, %arg5: memref<1x8x256xf32, #tpu.memory_space<vmem>>, %arg6: memref<2x8x384xbf16, #tpu.memory_space<vmem>>, %arg7: memref<2x!tpu.dma_semaphore, #tpu.memory_space<semaphore_mem>>) attributes {dimension_semantics = [#tpu.dimension_semantics<parallel>, #tpu.dimension_semantics<arbitrary>], iteration_bounds = array<i64: 2, 1>, scalar_prefetch = 0 : i64, scratch_operands = 2 : i64, tpu.core_type = #tpu.core_type<tc>, window_params = [{}, {pipeline_mode = #tpu.pipeline_mode<synchronous>, transform_indices = @transform_1, window_bounds = array<i64: 9, 8, 8>}, {pipeline_mode = #tpu.pipeline_mode<synchronous>, transform_indices = @transform_2, window_bounds = array<i64: 8, 1>}, {transform_indices = @transform_3, window_bounds = array<i64: 1, 8, 256>}]} {
    %c2_i32 = arith.constant 2 : i32
    %c0_i32 = arith.constant 0 : i32
    %0 = arith.cmpi eq, %c2_i32, %c0_i32 : i32
    %c1_i32 = arith.constant 1 : i32
    %1 = arith.select %0, %c1_i32, %c2_i32 : i32
    %2 = arith.remsi %arg1, %1 : i32
    %c0_i32_0 = arith.constant 0 : i32
    %3 = arith.cmpi ne, %2, %c0_i32_0 : i32
    %c0_i32_1 = arith.constant 0 : i32
    %4 = arith.cmpi slt, %2, %c0_i32_1 : i32
    %c0_i32_2 = arith.constant 0 : i32
    %5 = arith.cmpi slt, %1, %c0_i32_2 : i32
    %6 = arith.xori %4, %5 : i1
    %7 = arith.andi %6, %3 : i1
    %8 = arith.addi %2, %1 : i32
    %9 = arith.select %7, %8, %2 : i32
    %c0_i32_3 = arith.constant 0 : i32
    %10 = arith.cmpi eq, %arg1, %c0_i32_3 : i32
    %11 = arith.extui %10 : i1 to i32
    %c0_i32_4 = arith.constant 0 : i32
    %12 = arith.cmpi ne, %11, %c0_i32_4 : i32
    scf.if %12 {
      %c0_i32_48 = arith.constant 0 : i32
      %c0_i32_49 = arith.constant 0 : i32
      %c0_i32_50 = arith.constant 0 : i32
      %c0_i32_51 = arith.constant 0 : i32
      %91 = tpu.memref_slice %arg2[%arg0, %c0_i32_50, %c0_i32_51] : memref<2x8x384xbf16, #tpu.memory_space<any>> -> memref<1x8x384xbf16, #tpu.memory_space<any>>
      %92 = tpu.memref_squeeze %91 : memref<1x8x384xbf16, #tpu.memory_space<any>> -> memref<8x384xbf16, #tpu.memory_space<any>>
      %c0_i32_52 = arith.constant 0 : i32
      %c0_i32_53 = arith.constant 0 : i32
      %93 = tpu.memref_slice %arg6[%c0_i32_48, %c0_i32_52, %c0_i32_53] : memref<2x8x384xbf16, #tpu.memory_space<vmem>> -> memref<1x8x384xbf16, #tpu.memory_space<vmem>>
      %94 = tpu.memref_squeeze %93 : memref<1x8x384xbf16, #tpu.memory_space<vmem>> -> memref<8x384xbf16, #tpu.memory_space<vmem>>
      %95 = tpu.memref_slice %arg7[%c0_i32_49] : memref<2x!tpu.dma_semaphore, #tpu.memory_space<semaphore_mem>> -> memref<1x!tpu.dma_semaphore, #tpu.memory_space<semaphore_mem>>
      %96 = tpu.memref_squeeze %95 : memref<1x!tpu.dma_semaphore, #tpu.memory_space<semaphore_mem>> -> memref<!tpu.dma_semaphore, #tpu.memory_space<semaphore_mem>>
      tpu.enqueue_dma source(%92 : memref<8x384xbf16, #tpu.memory_space<any>>) target(%94 : memref<8x384xbf16, #tpu.memory_space<vmem>>) target_semaphore(%96 : memref<!tpu.dma_semaphore, #tpu.memory_space<semaphore_mem>>)
    } else {
    }
    %c1_i32_5 = arith.constant 1 : i32
    %13 = arith.addi %arg1, %c1_i32_5 : i32
    %c1_i32_6 = arith.constant 1 : i32
    %14 = arith.cmpi slt, %13, %c1_i32_6 : i32
    %15 = arith.extui %14 : i1 to i32
    %c0_i32_7 = arith.constant 0 : i32
    %16 = arith.cmpi ne, %15, %c0_i32_7 : i32
    scf.if %16 {
      %c1_i32_48 = arith.constant 1 : i32
      %91 = arith.addi %arg1, %c1_i32_48 : i32
      %c1_i32_49 = arith.constant 1 : i32
      %92 = arith.addi %arg1, %c1_i32_49 : i32
      %c2_i32_50 = arith.constant 2 : i32
      %c0_i32_51 = arith.constant 0 : i32
      %93 = arith.cmpi eq, %c2_i32_50, %c0_i32_51 : i32
      %c1_i32_52 = arith.constant 1 : i32
      %94 = arith.select %93, %c1_i32_52, %c2_i32_50 : i32
      %95 = arith.remsi %92, %94 : i32
      %c0_i32_53 = arith.constant 0 : i32
      %96 = arith.cmpi ne, %95, %c0_i32_53 : i32
      %c0_i32_54 = arith.constant 0 : i32
      %97 = arith.cmpi slt, %95, %c0_i32_54 : i32
      %c0_i32_55 = arith.constant 0 : i32
      %98 = arith.cmpi slt, %94, %c0_i32_55 : i32
      %99 = arith.xori %97, %98 : i1
      %100 = arith.andi %99, %96 : i1
      %101 = arith.addi %95, %94 : i32
      %102 = arith.select %100, %101, %95 : i32
      %c256_i32_56 = arith.constant 256 : i32
      %103 = arith.muli %91, %c256_i32_56 : i32
      %104 = tpu.assume_multiple %103, 128 : i32
      %c0_i32_57 = arith.constant 0 : i32
      %105 = tpu.memref_slice %arg2[%arg0, %c0_i32_57, %104] : memref<2x8x384xbf16, #tpu.memory_space<any>> -> memref<1x8x384xbf16, #tpu.memory_space<any>>
      %106 = tpu.memref_squeeze %105 : memref<1x8x384xbf16, #tpu.memory_space<any>> -> memref<8x384xbf16, #tpu.memory_space<any>>
      %c0_i32_58 = arith.constant 0 : i32
      %c0_i32_59 = arith.constant 0 : i32
      %107 = tpu.memref_slice %arg6[%102, %c0_i32_58, %c0_i32_59] : memref<2x8x384xbf16, #tpu.memory_space<vmem>> -> memref<1x8x384xbf16, #tpu.memory_space<vmem>>
      %108 = tpu.memref_squeeze %107 : memref<1x8x384xbf16, #tpu.memory_space<vmem>> -> memref<8x384xbf16, #tpu.memory_space<vmem>>
      %109 = tpu.memref_slice %arg7[%102] : memref<2x!tpu.dma_semaphore, #tpu.memory_space<semaphore_mem>> -> memref<1x!tpu.dma_semaphore, #tpu.memory_space<semaphore_mem>>
      %110 = tpu.memref_squeeze %109 : memref<1x!tpu.dma_semaphore, #tpu.memory_space<semaphore_mem>> -> memref<!tpu.dma_semaphore, #tpu.memory_space<semaphore_mem>>
      tpu.enqueue_dma source(%106 : memref<8x384xbf16, #tpu.memory_space<any>>) target(%108 : memref<8x384xbf16, #tpu.memory_space<vmem>>) target_semaphore(%110 : memref<!tpu.dma_semaphore, #tpu.memory_space<semaphore_mem>>)
    } else {
    }
    %c256_i32 = arith.constant 256 : i32
    %17 = arith.muli %arg1, %c256_i32 : i32
    %18 = tpu.assume_multiple %17, 128 : i32
    %c0_i32_8 = arith.constant 0 : i32
    %19 = tpu.memref_slice %arg2[%arg0, %c0_i32_8, %18] : memref<2x8x384xbf16, #tpu.memory_space<any>> -> memref<1x8x384xbf16, #tpu.memory_space<any>>
    %20 = tpu.memref_squeeze %19 : memref<1x8x384xbf16, #tpu.memory_space<any>> -> memref<8x384xbf16, #tpu.memory_space<any>>
    %c0_i32_9 = arith.constant 0 : i32
    %c0_i32_10 = arith.constant 0 : i32
    %21 = tpu.memref_slice %arg6[%9, %c0_i32_9, %c0_i32_10] : memref<2x8x384xbf16, #tpu.memory_space<vmem>> -> memref<1x8x384xbf16, #tpu.memory_space<vmem>>
    %22 = tpu.memref_squeeze %21 : memref<1x8x384xbf16, #tpu.memory_space<vmem>> -> memref<8x384xbf16, #tpu.memory_space<vmem>>
    %23 = tpu.memref_slice %arg7[%9] : memref<2x!tpu.dma_semaphore, #tpu.memory_space<semaphore_mem>> -> memref<1x!tpu.dma_semaphore, #tpu.memory_space<semaphore_mem>>
    %24 = tpu.memref_squeeze %23 : memref<1x!tpu.dma_semaphore, #tpu.memory_space<semaphore_mem>> -> memref<!tpu.dma_semaphore, #tpu.memory_space<semaphore_mem>>
    tpu.wait_dma2 semaphore(%24 : memref<!tpu.dma_semaphore, #tpu.memory_space<semaphore_mem>>) src(%20 : memref<8x384xbf16, #tpu.memory_space<any>>) dst(%22 : memref<8x384xbf16, #tpu.memory_space<vmem>>)
    %25 = arith.index_cast %9 : i32 to index
    %c0 = arith.constant 0 : index
    %c0_11 = arith.constant 0 : index
    %26 = vector.load %arg6[%25, %c0, %c0_11] : memref<2x8x384xbf16, #tpu.memory_space<vmem>>, vector<1x8x384xbf16>
    %27 = vector.shape_cast %26 : vector<1x8x384xbf16> to vector<8x384xbf16>
    %c0_12 = arith.constant 0 : index
    %c0_13 = arith.constant 0 : index
    %c0_14 = arith.constant 0 : index
    %28 = vector.load %arg3[%c0_12, %c0_13, %c0_14] : memref<9x8x8xbf16, #tpu.memory_space<vmem>>, vector<1x8x8xbf16>
    %29 = vector.shape_cast %28 : vector<1x8x8xbf16> to vector<8x8xbf16>
    %30 = vector.extract_strided_slice %27 {offsets = [0, 0], sizes = [8, 256], strides = [1, 1]} : vector<8x384xbf16> to vector<8x256xbf16>
    %cst = arith.constant dense<0.000000e+00> : vector<8x256xf32>
    %31 = tpu.matmul %29, %30, %cst {dimension_numbers = #tpu.dot_dimension_numbers<[1], [0], [0], [1], [0, 0, 1, 1], [], []>} : vector<8x8xbf16>, vector<8x256xbf16>, vector<8x256xf32> -> vector<8x256xf32>
    %c1 = arith.constant 1 : index
    %c0_15 = arith.constant 0 : index
    %c0_16 = arith.constant 0 : index
    %32 = vector.load %arg3[%c1, %c0_15, %c0_16] : memref<9x8x8xbf16, #tpu.memory_space<vmem>>, vector<1x8x8xbf16>
    %33 = vector.shape_cast %32 : vector<1x8x8xbf16> to vector<8x8xbf16>
    %34 = vector.extract_strided_slice %27 {offsets = [0, 1], sizes = [8, 256], strides = [1, 1]} : vector<8x384xbf16> to vector<8x256xbf16>
    %cst_17 = arith.constant dense<0.000000e+00> : vector<8x256xf32>
    %35 = tpu.matmul %33, %34, %cst_17 {dimension_numbers = #tpu.dot_dimension_numbers<[1], [0], [0], [1], [0, 0, 1, 1], [], []>} : vector<8x8xbf16>, vector<8x256xbf16>, vector<8x256xf32> -> vector<8x256xf32>
    %36 = arith.addf %31, %35 : vector<8x256xf32>
    %c2 = arith.constant 2 : index
    %c0_18 = arith.constant 0 : index
    %c0_19 = arith.constant 0 : index
    %37 = vector.load %arg3[%c2, %c0_18, %c0_19] : memref<9x8x8xbf16, #tpu.memory_space<vmem>>, vector<1x8x8xbf16>
    %38 = vector.shape_cast %37 : vector<1x8x8xbf16> to vector<8x8xbf16>
    %39 = vector.extract_strided_slice %27 {offsets = [0, 2], sizes = [8, 256], strides = [1, 1]} : vector<8x384xbf16> to vector<8x256xbf16>
    %cst_20 = arith.constant dense<0.000000e+00> : vector<8x256xf32>
    %40 = tpu.matmul %38, %39, %cst_20 {dimension_numbers = #tpu.dot_dimension_numbers<[1], [0], [0], [1], [0, 0, 1, 1], [], []>} : vector<8x8xbf16>, vector<8x256xbf16>, vector<8x256xf32> -> vector<8x256xf32>
    %41 = arith.addf %36, %40 : vector<8x256xf32>
    %c3 = arith.constant 3 : index
    %c0_21 = arith.constant 0 : index
    %c0_22 = arith.constant 0 : index
    %42 = vector.load %arg3[%c3, %c0_21, %c0_22] : memref<9x8x8xbf16, #tpu.memory_space<vmem>>, vector<1x8x8xbf16>
    %43 = vector.shape_cast %42 : vector<1x8x8xbf16> to vector<8x8xbf16>
    %44 = vector.extract_strided_slice %27 {offsets = [0, 16], sizes = [8, 256], strides = [1, 1]} : vector<8x384xbf16> to vector<8x256xbf16>
    %cst_23 = arith.constant dense<0.000000e+00> : vector<8x256xf32>
    %45 = tpu.matmul %43, %44, %cst_23 {dimension_numbers = #tpu.dot_dimension_numbers<[1], [0], [0], [1], [0, 0, 1, 1], [], []>} : vector<8x8xbf16>, vector<8x256xbf16>, vector<8x256xf32> -> vector<8x256xf32>
    %46 = arith.addf %41, %45 : vector<8x256xf32>
    %c4 = arith.constant 4 : index
    %c0_24 = arith.constant 0 : index
    %c0_25 = arith.constant 0 : index
    %47 = vector.load %arg3[%c4, %c0_24, %c0_25] : memref<9x8x8xbf16, #tpu.memory_space<vmem>>, vector<1x8x8xbf16>
    %48 = vector.shape_cast %47 : vector<1x8x8xbf16> to vector<8x8xbf16>
    %49 = vector.extract_strided_slice %27 {offsets = [0, 17], sizes = [8, 256], strides = [1, 1]} : vector<8x384xbf16> to vector<8x256xbf16>
    %cst_26 = arith.constant dense<0.000000e+00> : vector<8x256xf32>
    %50 = tpu.matmul %48, %49, %cst_26 {dimension_numbers = #tpu.dot_dimension_numbers<[1], [0], [0], [1], [0, 0, 1, 1], [], []>} : vector<8x8xbf16>, vector<8x256xbf16>, vector<8x256xf32> -> vector<8x256xf32>
    %51 = arith.addf %46, %50 : vector<8x256xf32>
    %c5 = arith.constant 5 : index
    %c0_27 = arith.constant 0 : index
    %c0_28 = arith.constant 0 : index
    %52 = vector.load %arg3[%c5, %c0_27, %c0_28] : memref<9x8x8xbf16, #tpu.memory_space<vmem>>, vector<1x8x8xbf16>
    %53 = vector.shape_cast %52 : vector<1x8x8xbf16> to vector<8x8xbf16>
    %54 = vector.extract_strided_slice %27 {offsets = [0, 18], sizes = [8, 256], strides = [1, 1]} : vector<8x384xbf16> to vector<8x256xbf16>
    %cst_29 = arith.constant dense<0.000000e+00> : vector<8x256xf32>
    %55 = tpu.matmul %53, %54, %cst_29 {dimension_numbers = #tpu.dot_dimension_numbers<[1], [0], [0], [1], [0, 0, 1, 1], [], []>} : vector<8x8xbf16>, vector<8x256xbf16>, vector<8x256xf32> -> vector<8x256xf32>
    %56 = arith.addf %51, %55 : vector<8x256xf32>
    %c6 = arith.constant 6 : index
    %c0_30 = arith.constant 0 : index
    %c0_31 = arith.constant 0 : index
    %57 = vector.load %arg3[%c6, %c0_30, %c0_31] : memref<9x8x8xbf16, #tpu.memory_space<vmem>>, vector<1x8x8xbf16>
    %58 = vector.shape_cast %57 : vector<1x8x8xbf16> to vector<8x8xbf16>
    %59 = vector.extract_strided_slice %27 {offsets = [0, 32], sizes = [8, 256], strides = [1, 1]} : vector<8x384xbf16> to vector<8x256xbf16>
    %cst_32 = arith.constant dense<0.000000e+00> : vector<8x256xf32>
    %60 = tpu.matmul %58, %59, %cst_32 {dimension_numbers = #tpu.dot_dimension_numbers<[1], [0], [0], [1], [0, 0, 1, 1], [], []>} : vector<8x8xbf16>, vector<8x256xbf16>, vector<8x256xf32> -> vector<8x256xf32>
    %61 = arith.addf %56, %60 : vector<8x256xf32>
    %c7 = arith.constant 7 : index
    %c0_33 = arith.constant 0 : index
    %c0_34 = arith.constant 0 : index
    %62 = vector.load %arg3[%c7, %c0_33, %c0_34] : memref<9x8x8xbf16, #tpu.memory_space<vmem>>, vector<1x8x8xbf16>
    %63 = vector.shape_cast %62 : vector<1x8x8xbf16> to vector<8x8xbf16>
    %64 = vector.extract_strided_slice %27 {offsets = [0, 33], sizes = [8, 256], strides = [1, 1]} : vector<8x384xbf16> to vector<8x256xbf16>
    %cst_35 = arith.constant dense<0.000000e+00> : vector<8x256xf32>
    %65 = tpu.matmul %63, %64, %cst_35 {dimension_numbers = #tpu.dot_dimension_numbers<[1], [0], [0], [1], [0, 0, 1, 1], [], []>} : vector<8x8xbf16>, vector<8x256xbf16>, vector<8x256xf32> -> vector<8x256xf32>
    %66 = arith.addf %61, %65 : vector<8x256xf32>
    %c8 = arith.constant 8 : index
    %c0_36 = arith.constant 0 : index
    %c0_37 = arith.constant 0 : index
    %67 = vector.load %arg3[%c8, %c0_36, %c0_37] : memref<9x8x8xbf16, #tpu.memory_space<vmem>>, vector<1x8x8xbf16>
    %68 = vector.shape_cast %67 : vector<1x8x8xbf16> to vector<8x8xbf16>
    %69 = vector.extract_strided_slice %27 {offsets = [0, 34], sizes = [8, 256], strides = [1, 1]} : vector<8x384xbf16> to vector<8x256xbf16>
    %cst_38 = arith.constant dense<0.000000e+00> : vector<8x256xf32>
    %70 = tpu.matmul %68, %69, %cst_38 {dimension_numbers = #tpu.dot_dimension_numbers<[1], [0], [0], [1], [0, 0, 1, 1], [], []>} : vector<8x8xbf16>, vector<8x256xbf16>, vector<8x256xf32> -> vector<8x256xf32>
    %71 = arith.addf %66, %70 : vector<8x256xf32>
    %c0_39 = arith.constant 0 : index
    %c0_40 = arith.constant 0 : index
    %72 = vector.load %arg4[%c0_39, %c0_40] : memref<8x1xf32, #tpu.memory_space<vmem>>, vector<8x1xf32>
    %73 = vector.broadcast %72 : vector<8x1xf32> to vector<8x256xf32>
    %74 = arith.addf %71, %73 : vector<8x256xf32>
    %cst_41 = arith.constant 2.000000e-01 : f32
    %75 = vector.broadcast %cst_41 : f32 to vector<8x256xf32>
    %76 = arith.mulf %75, %74 : vector<8x256xf32>
    %77 = arith.maximumf %74, %76 : vector<8x256xf32>
    %78 = arith.mulf %77, %77 : vector<8x256xf32>
    %cst_42 = arith.constant dense<0.000000e+00> : vector<256xf32>
    %79 = vector.multi_reduction <add>, %78, %cst_42 [0] : vector<8x256xf32> to vector<256xf32>
    %80 = vector.shape_cast %79 : vector<256xf32> to vector<1x256xf32>
    %cst_43 = arith.constant 1.250000e-01 : f32
    %81 = vector.broadcast %cst_43 : f32 to vector<1x256xf32>
    %82 = arith.mulf %80, %81 : vector<1x256xf32>
    %cst_44 = arith.constant 9.99999993E-9 : f32
    %83 = vector.broadcast %cst_44 : f32 to vector<1x256xf32>
    %84 = arith.addf %82, %83 : vector<1x256xf32>
    %85 = math.rsqrt %84 : vector<1x256xf32>
    %86 = vector.broadcast %85 : vector<1x256xf32> to vector<8x256xf32>
    %87 = arith.mulf %77, %86 : vector<8x256xf32>
    %c0_45 = arith.constant 0 : index
    %c0_46 = arith.constant 0 : index
    %c0_47 = arith.constant 0 : index
    %88 = vector.load %arg5[%c0_45, %c0_46, %c0_47] : memref<1x8x256xf32, #tpu.memory_space<vmem>>, vector<1x8x256xf32>
    %89 = vector.shape_cast %88 : vector<1x8x256xf32> to vector<8x256xf32>
    %90 = vector.shape_cast %87 : vector<8x256xf32> to vector<1x8x256xf32>
    tpu.vector_store %arg5[%c0_45, %c0_46, %c0_47], %90 {strides = array<i32>} : memref<1x8x256xf32, #tpu.memory_space<vmem>>, vector<1x8x256xf32>,
    return
  }
  func.func @transform_1(%arg0: i32, %arg1: i32) -> (i32, i32, i32) {
    %c0_i32 = arith.constant 0 : i32
    %c0_i32_0 = arith.constant 0 : i32
    %c0_i32_1 = arith.constant 0 : i32
    %c0_i32_2 = arith.constant 0 : i32
    return %c0_i32, %c0_i32_0, %c0_i32_1 : i32, i32, i32
  }
  func.func @transform_2(%arg0: i32, %arg1: i32) -> (i32, i32) {
    %c0_i32 = arith.constant 0 : i32
    %c0_i32_0 = arith.constant 0 : i32
    %c0_i32_1 = arith.constant 0 : i32
    return %c0_i32, %c0_i32_0 : i32, i32
  }
  func.func @transform_3(%arg0: i32, %arg1: i32) -> (i32, i32, i32) {
    %c0_i32 = arith.constant 0 : i32
    %c0_i32_0 = arith.constant 0 : i32
    return %arg0, %c0_i32, %arg1 : i32, i32, i32
  }
}

</mosaic_0001>

<bundles_post_ra>
// kernel: tpu_custom_call.1
= control target key start
LH: loop header
LB: loop body
LE: loop exit
PB: predicated region body
PF: predicated region fallthrough
CT: control target
= control target key end

     0   :  { %8 = vsyncpa [#allocation5], 0  ;;  %s1456_s0 = inlined_call_operand.vmem [shape: bf16[2,8,384], index: 0, kind: input, shape index: {}]   ;;  %s1457_s1 = inlined_call_operand.vmem [shape: bf16[9,8,8], index: 1, kind: input, shape index: {}]   ;;  %s1458_s2 = inlined_call_operand.vmem [shape: f32[8,1], index: 2, kind: input, shape index: {}]   ;;  %s1459_s3 = inlined_call_operand.hbm [shape: f32[2,8,256], index: 3, kind: output, shape index: {}]  }
   0x1   :  { %10 = vsyncpa [#allocation5 + $0x1], 0  ;;  %s1269_s12 = smov 0   ;;  %s1271_s13 = smov 0  }
   0x2   :  { %s1273_s14 = smov 0   ;;  %s1275_s15 = smov 0  }
   0x3   :  { %s1277_s16 = smov 0   ;;  %s1279_s17 = smov 0  }
   0x4 LB: > { %s1032_s18 = sadd.s32 4294967295, %s1237_s17   ;;  %s1033_s19 = sadd.s32 4294967294, %s1237_s17   ;;  %s1237_s17 = sphi %s1279_s17, %s16_s17   ;;  %s1233_s16 = sphi %s1277_s16, %s1466_s16   ;;  %s1229_s15 = sphi %s1275_s15, %s1465_s15   ;;  %s1225_s14 = sphi %s1273_s14, %s1464_s14   ;;  %s1221_s13 = sphi %s1271_s13, %s1463_s13   ;;  %s1217_s12 = sphi %s1269_s12, %s1462_s12  }
   0x5   : > { %s28_s20 = sadd.s32 1, %s1233_s16  ;;  %s79_s21 = sadd.s32 1, %s1225_s14 }
   0x6   : > { %p30_p0 = scmp.ge.s32.totalorder %s28_s20, 2  ;;  %p89_p1 = scmp.ne.s32.totalorder %s1225_s14, %s1221_s13 }
   0x7   : > { %p90_p2 = scmp.eq.s32.totalorder %s1032_s18, 1  ;;  %p95_p3 = scmp.ne.s32.totalorder %s1221_s13, %s1217_s12 }
   0x8   : > { %s1468_s20 = smov (%p30_p0, %s28_s20), 0  ;;  %p96_p5 = scmp.eq.s32.totalorder %s1033_s19, 1 }
   0x9   : > { %p1309_p4 = por %p90_p2, %p89_p1  ;;  %s74_s23 = ssub.s32 %s1233_s16, %s1468_s20 }
   0xa   : > { %p1035_p6 = scmp.ge.s32.totalorder %s1237_s17, 1  ;;  %p77_p7 = scmp.eq.s32.totalorder %s74_s23, 0 }
   0xb   : > { %p1316_p8 = por %p96_p5, %p95_p3  ;;  %p120_p9 = scmp.lt.s32.totalorder %s1237_s17, 3 }
   0xc   : > { %s1322_s25 = scalar_select %p77_p7, %s1225_s14, %s79_s21  }
   0xd   : > { %p121_p10 = pnand %p1035_p6, %p120_p9 }
   0xe   : > { %s134_s26 = sand.u32 (!%p121_p10), 1, %s1221_s13   ;;  %s1081_s27 = smul.u32 (!%p121_p10), 12, %s1229_s15 }
   0xf   : > { %124 = sbr.rel (%p121_p10) target bundleno = 458 (0x1ca), region = 28  ;;  %s1036_s28 = sshll.u32 (!%p121_p10), %s134_s26, 4 }
  0x10   : > { %s157_s4 = scalar_lea.vmem (!%p121_p10), %s1456_s0, %s1081_s27  ;;  %s1331_s5 = scalar_lea.vmem (!%p121_p10), [#allocation4], %s1036_s28 }
  0x11   : > { %v195_v0 = vld [vmem:[%s157_s4] sm:$0xff] (!%p121_p10)  ;;  %v1038_v1 = vld [vmem:[%s157_s4 + $0x8] sm:$0xf] (!%p121_p10) }
  0x12   : > { %196 = vst [vmem:[#allocation2] sm:$0xff] (!%p121_p10), %v195_v0  ;;  %207 = vst [vmem:[#allocation2 + $0x8] sm:$0xf] (!%p121_p10), %v1038_v1 }
  0x16   : > { %211 = vsyncadd [#allocation3], 192 }
  0x17   : > { %1209 = dma.done.wait [#allocation3], 192 }
  0x18   : > { %1210 = vsyncadd [#allocation3], 4294967104  ;;  %v1239_v2 = vmov 0   ;;  %s1240_s6 = smov 127   ;;  %vm329_vm0 = vcmask 1043456   ;;  %s1241_s9 = smov 126  }
  0x19   : > { %368 = vmatprep.mubr.bf16.mxu0 %v1239_v2  ;;  %418 = vmatprep.mubr.bf16.mxu1 %v1239_v2  ;;  %v1150_v3 = vld [vmem:[#allocation2 + $0x8] ss:$0 sps:$4 sm:$0xff]   ;;  %v303_v4 = vld [vmem:[#allocation2] sm:$0xff]  ;;  %vm325_vm1 = vcmask 64512   ;;  %s1242_s10 = smov 112   ;;  %s1243_s11 = smov 111  }
  0x1a   : > { %1149 = vset.pattern.permute.xlu0 %v1239_v2  ;;  %v1046_v5 = vcombine.low %v303_v4, %v303_v4  ;;  %v1047_v6 = vcombine.high %v303_v4, %v303_v4  ;;  %320 = vrot.lane.b32.xlu1 %v1150_v3, %s1240_s6  ;;  %v305_v8 = vld [vmem:[%s1457_s1] sm:$0xf]  ;;  %s1244_s18 = smov 110   ;;  %s1245_s19 = smov 96   ;;  %vm322_vm2 = vcmask 1039360   ;;  %vm435_vm3 = vcmask 1031168  }
  0x1b   : > { %s1246_s21 = smov 95   ;;  %s1247_s23 = smov 94   ;;  %v868_v9 = vld [vmem:[%s1458_s2] sm:$0xff]  ;;  %vm498_vm4 = vcmask 916480   ;;  %v1053_v27 = vld [vmem:[%s1457_s1 + $0x8] sm:$0xf] }
  0x1c   : > { %316 = vrot.lane.b32.xlu0 %v1046_v5, %s1240_s6  ;;  %1051 = vmatprep.subr.msk.bf16.mxu1 %vm329_vm0, %v1047_v6  ;;  %v381_v7 = vsel %vm329_vm0, %v1046_v5, 0  ;;  %v1045_v18 = vld [vmem:[%s1457_s1 + $0x4] sm:$0xf]  ;;  %vm561_vm5 = vcmask 908288   ;;  %v1056_v32 = vld [vmem:[%s1457_s1 + $0xc] sm:$0xf] }
  0x1d   : > { %387 = vmatpush1.bf16.msra.mxu1 %v381_v7  ;;  %v1059_v38 = vld [vmem:[%s1457_s1 + $0x10] sm:$0xf]  ;;  %vm624_vm6 = vcmask 900096   ;;  %vm687_vm7 = vcmask 785408   ;;  %v1062_v46 = vld [vmem:[%s1457_s1 + $0x14] sm:$0xf] }
  0x1e   : > { %429 = vrot.lane.b32.xlu1 %v1046_v5, %s1241_s9  ;;  %v1065_v52 = vld [vmem:[%s1457_s1 + $0x18] sm:$0xf]  ;;  %vm750_vm8 = vcmask 777216   ;;  %vm813_vm9 = vcmask 769024   ;;  %v1068_v60 = vld [vmem:[%s1457_s1 + $0x1c] sm:$0xf] }
  0x1f   : > { %v1071_v1 = vld [vmem:[%s1457_s1 + $0x20] sm:$0xf]  ;;  %s1084_s30 = sshll.u32 %s1229_s15, 8  ;;  %s921_s4 = sshll.u32 %s1331_s5, 4  ;;  %s1407_s4 = int_to_ptr.vmem [resolvable:$true] %s921_s4 }
  0x20   : > { %318 = vrot.lane.b32.xlu0 %v1047_v6, %s1240_s6  ;;  %1052 = vmatmul.mubr.msk.bf16.vlgmr.msra.gmra.mrb[0].mxu1 %vm325_vm1, %v305_v8  ;;  %s1405_s8 = scalar_lea.hbm %s1459_s3, %s1084_s30  ;;  %s1157_s15 = scalar_lea.vmem %s1407_s4, 256 }
  0x21   : > { %542 = vmatprep.mubr.bf16.mxu1 %v1239_v2  ;;  %p1158_p11 = scmp.ne.s32.totalorder %s1407_s4, %s1157_s15 }
  0x22   : > { %433 = vrot.lane.b32.xlu1 %v1150_v3, %s1241_s9 }
  0x23   : > { %p1159_p12 = pnand %p1158_p11, %p1309_p4 }
  0x24   : > { %431 = vrot.lane.b32.xlu0 %v1047_v6, %s1241_s9  ;;  %s905_s9 = scalar_lea.sflag [#allocation5], %s134_s26 }
  0x25   : > { %p1160_p13 = pneg %p1159_p12 }
  0x26   : > { %494 = vrot.lane.b32.xlu1 %v1047_v6, %s1242_s10 }
  0x28   : > { %492 = vrot.lane.b32.xlu0 %v1046_v5, %s1242_s10 }
  0x2a   : > { %555 = vrot.lane.b32.xlu1 %v1046_v5, %s1243_s11 }
  0x2c   : > { %496 = vrot.lane.b32.xlu0 %v1150_v3, %s1242_s10  ;;  %s1248_s10 = smov [#allocation4]  }
  0x2e   : > { %559 = vrot.lane.b32.xlu1 %v1150_v3, %s1243_s11 }
  0x30   : > { %557 = vrot.lane.b32.xlu0 %v1047_v6, %s1243_s11  ;;  %s1161_s11 = sshll.u32 %s1248_s10, 4  ;;  %s1162_s11 = int_to_ptr.vmem [resolvable:$false] %s1161_s11 }
  0x31   : > { %p1164_p0 = scmp.lt.s32.totalorder %s1407_s4, %s1162_s11 }
  0x32   : > { %620 = vrot.lane.b32.xlu1 %v1047_v6, %s1244_s18 }
  0x34   : > { %618 = vrot.lane.b32.xlu0 %v1046_v5, %s1244_s18 }
  0x36   : > { %681 = vrot.lane.b32.xlu1 %v1046_v5, %s1245_s19 }
  0x38   : > { %622 = vrot.lane.b32.xlu0 %v1150_v3, %s1244_s18  ;;  %s1163_s18 = scalar_lea.vmem %s1162_s11, 512 }
  0x39   : > { %p1165_p1 = scmp.lt.s32.totalorder %s1163_s18, %s1157_s15 }
  0x3a   : > { %685 = vrot.lane.b32.xlu1 %v1150_v3, %s1245_s19 }
  0x3b   : > { %p1166_p2 = por %p1165_p1, %p1164_p0 }
  0x3c   : > { %683 = vrot.lane.b32.xlu0 %v1047_v6, %s1245_s19 }
  0x3d   : > { %p1167_p3 = pnand %p1166_p2, %p1160_p13 }
  0x3e   : > { %746 = vrot.lane.b32.xlu1 %v1047_v6, %s1246_s21 }
  0x40   : > { %744 = vrot.lane.b32.xlu0 %v1046_v5, %s1246_s21 }
  0x42   : > { %807 = vrot.lane.b32.xlu1 %v1046_v5, %s1247_s23 }
  0x44   : > { %748 = vrot.lane.b32.xlu0 %v1150_v3, %s1246_s21 }
  0x46   : > { %811 = vrot.lane.b32.xlu1 %v1150_v3, %s1247_s23 }
  0x48   : > { %809 = vrot.lane.b32.xlu0 %v1047_v6, %s1247_s23 }
  0x4c   : > { %871 = vperm.xlu0 %1149, %v868_v9  }
  0x8c   : > { %v321_v10 = vpop.permute.xlu1 %320 }
  0x8e   : > { %v317_v11 = vpop.permute.xlu0 %316 }
  0x90   : > { %v430_v12 = vpop.permute.xlu1 %429 }
  0x92   : > { %v319_v13 = vpop.permute.xlu0 %318 }
  0x93   : > { %v324_v14 = vsel %vm322_vm2, %v319_v13, %v321_v10  ;;  %v323_v15 = vsel %vm322_vm2, %v317_v11, %v319_v13 }
  0x94   : > { %1049 = vmatprep.subr.msk.bf16.mxu0 %vm329_vm0, %v324_v14  ;;  %v331_v16 = vsel %vm329_vm0, %v323_v15, 0  ;;  %v434_v17 = vpop.permute.xlu1 %433 }
  0x95   : > { %337 = vmatpush1.bf16.msra.mxu0 %v331_v16 }
  0x96   : > { %v432_v19 = vpop.permute.xlu0 %431 }
  0x97   : > { %v436_v20 = vsel %vm435_vm3, %v430_v12, %v432_v19  ;;  %v437_v21 = vsel %vm435_vm3, %v432_v19, %v434_v17 }
  0x98   : > { %v442_v22 = vsel %vm329_vm0, %v436_v20, 0  ;;  %1054 = vmatprep.subr.msk.bf16.mxu0 %vm329_vm0, %v437_v21  ;;  %1050 = vmatmul.mubr.msk.bf16.vlgmr.msra.gmra.mrb[0].mxu0 %vm325_vm1, %v1045_v18  ;;  %v495_v23 = vpop.permute.xlu1 %494 }
  0x99   : > { %448 = vmatpush1.bf16.msra.mxu0 %v442_v22  ;;  %479 = vmatprep.mubr.bf16.mxu0 %v1239_v2 }
  0x9a   : > { %v493_v24 = vpop.permute.xlu0 %492 }
  0x9b   : > { %v499_v25 = vsel %vm498_vm4, %v493_v24, %v495_v23 }
  0x9c   : > { %v556_v26 = vpop.permute.xlu1 %555  ;;  %v505_v30 = vsel %vm329_vm0, %v499_v25, 0 }
  0x9e   : > { %v497_v28 = vpop.permute.xlu0 %496 }
  0x9f   : > { %v500_v29 = vsel %vm498_vm4, %v495_v23, %v497_v28 }
  0xa0   : > { %1057 = vmatprep.subr.msk.bf16.mxu1 %vm329_vm0, %v500_v29  ;;  %1055 = vmatmul.mubr.msk.bf16.vlgmr.msra.gmra.mrb[4].mxu0 %vm325_vm1, %v1053_v27  ;;  %v560_v31 = vpop.permute.xlu1 %559 }
  0xa1   : > { %511 = vmatpush1.bf16.msra.mxu1 %v505_v30  ;;  %605 = vmatprep.mubr.bf16.mxu0 %v1239_v2 }
  0xa2   : > { %v558_v33 = vpop.permute.xlu0 %557 }
  0xa3   : > { %v562_v34 = vsel %vm561_vm5, %v556_v26, %v558_v33  ;;  %v563_v35 = vsel %vm561_vm5, %v558_v33, %v560_v31 }
  0xa4   : > { %v568_v36 = vsel %vm329_vm0, %v562_v34, 0  ;;  %1060 = vmatprep.subr.msk.bf16.mxu0 %vm329_vm0, %v563_v35  ;;  %1058 = vmatmul.mubr.msk.bf16.vlgmr.msra.gmra.mrb[4].mxu1 %vm325_vm1, %v1056_v32  ;;  %v621_v37 = vpop.permute.xlu1 %620 }
  0xa5   : > { %574 = vmatpush1.bf16.msra.mxu0 %v568_v36  ;;  %668 = vmatprep.mubr.bf16.mxu1 %v1239_v2 }
  0xa6   : > { %v619_v39 = vpop.permute.xlu0 %618 }
  0xa7   : > { %v625_v40 = vsel %vm624_vm6, %v619_v39, %v621_v37 }
  0xa8   : > { %1061 = vmatmul.mubr.msk.bf16.vlgmr.msra.gmra.mrb[8].mxu0 %vm325_vm1, %v1059_v38  ;;  %v682_v41 = vpop.permute.xlu1 %681  ;;  %v631_v44 = vsel %vm329_vm0, %v625_v40, 0 }
  0xa9   : > { %731 = vmatprep.mubr.bf16.mxu0 %v1239_v2 }
  0xaa   : > { %v623_v42 = vpop.permute.xlu0 %622 }
  0xab   : > { %v626_v43 = vsel %vm624_vm6, %v621_v37, %v623_v42 }
  0xac   : > { %1063 = vmatprep.subr.msk.bf16.mxu1 %vm329_vm0, %v626_v43  ;;  %v686_v45 = vpop.permute.xlu1 %685 }
  0xad   : > { %637 = vmatpush1.bf16.msra.mxu1 %v631_v44 }
  0xae   : > { %v684_v47 = vpop.permute.xlu0 %683 }
  0xaf   : > { %v688_v48 = vsel %vm687_vm7, %v682_v41, %v684_v47  ;;  %v689_v49 = vsel %vm687_vm7, %v684_v47, %v686_v45 }
  0xb0   : > { %v694_v50 = vsel %vm329_vm0, %v688_v48, 0  ;;  %1064 = vmatmul.mubr.msk.bf16.vlgmr.msra.gmra.mrb[8].mxu1 %vm325_vm1, %v1062_v46  ;;  %1066 = vmatprep.subr.msk.bf16.mxu0 %vm329_vm0, %v689_v49  ;;  %v747_v51 = vpop.permute.xlu1 %746 }
  0xb1   : > { %700 = vmatpush1.bf16.msra.mxu0 %v694_v50  ;;  %794 = vmatprep.mubr.bf16.mxu1 %v1239_v2 }
  0xb2   : > { %v745_v53 = vpop.permute.xlu0 %744 }
  0xb3   : > { %v751_v54 = vsel %vm750_vm8, %v745_v53, %v747_v51 }
  0xb4   : > { %1067 = vmatmul.mubr.msk.bf16.vlgmr.msra.gmra.mrb[12].mxu0 %vm325_vm1, %v1065_v52  ;;  %v808_v55 = vpop.permute.xlu1 %807  ;;  %v757_v58 = vsel %vm329_vm0, %v751_v54, 0 }
  0xb5   : > { %857 = vmatprep.mubr.bf16.mxu0 %v1239_v2 }
  0xb6   : > { %v749_v56 = vpop.permute.xlu0 %748 }
  0xb7   : > { %v752_v57 = vsel %vm750_vm8, %v747_v51, %v749_v56 }
  0xb8   : > { %1069 = vmatprep.subr.msk.bf16.mxu1 %vm329_vm0, %v752_v57  ;;  %v812_v59 = vpop.permute.xlu1 %811 }
  0xb9   : > { %763 = vmatpush1.bf16.msra.mxu1 %v757_v58 }
  0xba   : > { %v810_v61 = vpop.permute.xlu0 %809 }
  0xbb   : > { %v814_v62 = vsel %vm813_vm9, %v808_v55, %v810_v61  ;;  %v815_v63 = vsel %vm813_vm9, %v810_v61, %v812_v59 }
  0xbc   : > { %v820_v0 = vsel %vm329_vm0, %v814_v62, 0  ;;  %1070 = vmatmul.mubr.msk.bf16.vlgmr.msra.gmra.mrb[12].mxu1 %vm325_vm1, %v1068_v60  ;;  %1072 = vmatprep.subr.msk.bf16.mxu0 %vm329_vm0, %v815_v63 }
  0xbd   : > { %826 = vmatpush1.bf16.msra.mxu0 %v820_v0 }
  0xc0   : > { %1073 = vmatmul.mubr.msk.bf16.vlgmr.msra.gmra.mrb[16].mxu0 %vm325_vm1, %v1071_v1 }
  0xcb   : > { %v872_v49 = vpop.permute.xlu0 %871 }
  0xf3   : > { %v420_v2 = vpop.f32.mrb[0].mxu1 }
  0xf4   : > { %v422_v3 = vpop.f32.mrb[1].mxu1 }
  0xf5   : > { %v424_v4 = vpop.f32.mrb[2].mxu1 }
  0xf6   : > { %v425_v5 = vpop.f32.mrb[3].mxu1 }
 0x16b   : > { %v370_v6 = vpop.f32.mrb[0].mxu0 }
 0x16c   : > { %v372_v7 = vpop.f32.mrb[1].mxu0  ;;  %v421_v8 = vadd.f32 %v420_v2, %v370_v6 }
 0x16d   : > { %v374_v9 = vpop.f32.mrb[2].mxu0  ;;  %v423_v10 = vadd.f32 %v422_v3, %v372_v7 }
 0x16e   : > { %v375_v11 = vpop.f32.mrb[3].mxu0 }
 0x173   : > { %v481_v12 = vpop.f32.mrb[4].mxu0 }
 0x174   : > { %v488_v13 = vadd.f32 %v481_v12, %v421_v8  ;;  %v483_v14 = vpop.f32.mrb[5].mxu0 }
 0x175   : > { %v489_v15 = vadd.f32 %v483_v14, %v423_v10  ;;  %v485_v16 = vpop.f32.mrb[6].mxu0 }
 0x176   : > { %v486_v17 = vpop.f32.mrb[7].mxu0 }
 0x177   : > { %v544_v18 = vpop.f32.mrb[4].mxu1 }
 0x178   : > { %v551_v19 = vadd.f32 %v544_v18, %v488_v13  ;;  %v546_v20 = vpop.f32.mrb[5].mxu1 }
 0x179   : > { %v552_v21 = vadd.f32 %v546_v20, %v489_v15  ;;  %v548_v22 = vpop.f32.mrb[6].mxu1 }
 0x17a   : > { %v549_v23 = vpop.f32.mrb[7].mxu1 }
 0x17b   : > { %v607_v24 = vpop.f32.mrb[8].mxu0 }
 0x17c   : > { %v614_v25 = vadd.f32 %v607_v24, %v551_v19  ;;  %v609_v26 = vpop.f32.mrb[9].mxu0 }
 0x17d   : > { %v615_v27 = vadd.f32 %v609_v26, %v552_v21  ;;  %v611_v28 = vpop.f32.mrb[10].mxu0 }
 0x17e   : > { %v612_v29 = vpop.f32.mrb[11].mxu0 }
 0x183   : > { %v670_v30 = vpop.f32.mrb[8].mxu1 }
 0x184   : > { %v677_v31 = vadd.f32 %v670_v30, %v614_v25  ;;  %v672_v32 = vpop.f32.mrb[9].mxu1 }
 0x185   : > { %v678_v33 = vadd.f32 %v672_v32, %v615_v27  ;;  %v674_v34 = vpop.f32.mrb[10].mxu1 }
 0x186   : > { %v675_v35 = vpop.f32.mrb[11].mxu1 }
 0x187   : > { %v733_v36 = vpop.f32.mrb[12].mxu0 }
 0x188   : > { %v740_v37 = vadd.f32 %v733_v36, %v677_v31  ;;  %v735_v38 = vpop.f32.mrb[13].mxu0 }
 0x189   : > { %v741_v39 = vadd.f32 %v735_v38, %v678_v33  ;;  %v737_v40 = vpop.f32.mrb[14].mxu0 }
 0x18a   : > { %v738_v41 = vpop.f32.mrb[15].mxu0 }
 0x18f   : > { %v796_v42 = vpop.f32.mrb[12].mxu1 }
 0x190   : > { %v803_v43 = vadd.f32 %v796_v42, %v740_v37  ;;  %v798_v44 = vpop.f32.mrb[13].mxu1 }
 0x191   : > { %v804_v45 = vadd.f32 %v798_v44, %v741_v39  ;;  %v800_v46 = vpop.f32.mrb[14].mxu1 }
 0x192   : > { %v801_v47 = vpop.f32.mrb[15].mxu1 }
 0x193   : > { %v859_v48 = vpop.f32.mrb[16].mxu0 }
 0x194   : > { %v866_v50 = vadd.f32 %v859_v48, %v803_v43  ;;  %v861_v51 = vpop.f32.mrb[17].mxu0 }
 0x195   : > { %v867_v52 = vadd.f32 %v861_v51, %v804_v45  ;;  %v863_v53 = vpop.f32.mrb[18].mxu0 }
 0x196   : > { %v874_v54 = vadd.f32 %v872_v49, %v866_v50  ;;  %v864_v55 = vpop.f32.mrb[19].mxu0 }
 0x197   : > { %v875_v56 = vadd.f32 %v872_v49, %v867_v52 }
 0x198   : > { %v876_v57 = vmul.f32 0.2, %v874_v54 }
 0x199   : > { %v877_v58 = vmul.f32 0.2, %v875_v56 }
 0x19a   : > { %v878_v59 = vmax.f32 %v874_v54, %v876_v57 }
 0x19b   : > { %v879_v60 = vmax.f32 %v875_v56, %v877_v58 }
 0x19c   : > { %v880_v61 = vmul.f32 %v878_v59, %v878_v59 }
 0x19d   : > { %v881_v62 = vmul.f32 %v879_v60, %v879_v60 }
 0x19e   : > { %v882_v63 = vrot.slane %v880_v61, 4 }
 0x19f   : > { %v888_v0 = vrot.slane %v881_v62, 4 }
 0x1a0   : > { %v883_v1 = vadd.f32 %v882_v63, %v880_v61 }
 0x1a1   : > { %v889_v2 = vadd.f32 %v888_v0, %v881_v62 }
 0x1a2   : > { %v884_v3 = vrot.slane %v883_v1, 2 }
 0x1a3   : > { %v890_v4 = vrot.slane %v889_v2, 2 }
 0x1a4   : > { %v885_v5 = vadd.f32 %v884_v3, %v883_v1 }
 0x1a5   : > { %v891_v6 = vadd.f32 %v890_v4, %v889_v2 }
 0x1a6   : > { %v886_v7 = vrot.slane %v885_v5, 1 }
 0x1a7   : > { %v892_v8 = vrot.slane %v891_v6, 1 }
 0x1a8   : > { %v887_v9 = vadd.f32 %v886_v7, %v885_v5 }
 0x1a9   : > { %v893_v10 = vadd.f32 %v892_v8, %v891_v6 }
 0x1aa   : > { %v894_v11 = vmul.f32 0.125, %v887_v9 }
 0x1ab   : > { %v895_v12 = vmul.f32 0.125, %v893_v10 }
 0x1ac   : > { %v896_v13 = vadd.f32 1e-08, %v894_v11 }
 0x1ad   : > { %v897_v14 = vadd.f32 1e-08, %v895_v12 }
 0x1ae   : > { %1153 = vrsqrt.f32 %v896_v13 }
 0x1af   : > { %1155 = vrsqrt.f32 %v897_v14 }
 0x1b8   : > { %v1154_v15 = vpop.eup %1153 }
 0x1b9   : > { %v1156_v16 = vpop.eup %1155  ;;  %v900_v17 = vmul.f32 %v1154_v15, %v878_v59 }
 0x1ba   : > { %v901_v18 = vmul.f32 %v1156_v16, %v879_v60 }
 0x1bb   : > { %902 = vst [vmem:[%s1331_s5] sm:$0xff] %v900_v17 }
 0x1bc   : > { %903 = vst [vmem:[%s1331_s5 + $0x8] sm:$0xff] %v901_v18 }
 0x1bd   : > { %1170 = shalt.err (!%p1167_p3)
}
 0x1be   : > { %s1171_s26 = scalar_lea.hbm %s1405_s8, 256  ;;  %s1175_s21 = scalar_lea.hbm %s1459_s3, 512 }
 0x1bf   : > { %p1172_p5 = scmp.ne.s32.totalorder %s1405_s8, %s1171_s26  ;;  %p1176_p9 = scmp.lt.u32.totalorder %s1405_s8, %s1459_s3 }
 0x1c0   : > { %p1177_p10 = scmp.lt.u32.totalorder %s1175_s21, %s1171_s26  ;;  %p1179_p12 = scmp.lt.u32.totalorder %s1171_s26, %s1405_s8 }
 0x1c1   : > { %p1173_p6 = pnand %p1172_p5, %p1309_p4 }
 0x1c2   : > { %p1178_p11 = por %p1177_p10, %p1176_p9 }
 0x1c3   : > { %p1174_p7 = pneg %p1173_p6 }
 0x1c4   : > { %p1180_p13 = por %p1179_p12, %p1178_p11 }
 0x1c6   : > { %p1181_p0 = pnand %p1180_p13, %p1174_p7 }
 0x1c8   : > { %1184 = shalt.err (!%p1181_p0)
}
 0x1c9   : > { %1085 = dma.vmem_to_hbm [thread:$0]  (%p1309_p4), %s1407_s4, 256, %s1405_s8, %s905_s9  }
 0x1ca PF: > { %p1091_p1 = scmp.ge.s32.totalorder %s1237_s17, 2  ;;  %s933_s28 = sand.u32 1, %s1217_s12  }
 0x1cb   : > { %s934_s29 = scalar_lea.sflag [#allocation5], %s933_s28 }
 0x1cc   : > { %p1088_p2 = pnand %p1091_p1, %p1316_p8 }
 0x1ce   : > { %1212 = dma.done.wait (!%p1088_p2), %s934_s29, 256  }
 0x1cf   : > { %1214 = vsyncadd (!%p1088_p2), %s934_s29, 4294967040  ;;  %s16_s17 = sadd.s32 1, %s1237_s17   ;;  %s1462_s12 = smov %s1221_s13 }
 0x1d0   : > { %p13_p3 = scmp.ge.s32.totalorder %s16_s17, 4   ;;  %s1463_s13 = smov %s1225_s14 }
 0x1d1   : > { %s1464_s14 = smov %s1322_s25  ;;  %s1465_s15 = smov %s1233_s16 }
 0x1d2   : > { %s1466_s16 = smov %s1468_s20  ;;  %15 = sbr.rel (!%p13_p3) target bundleno = 4 (0x4), region = 185 }
 0x1d9   :  { %939 = vsyncpa [#allocation5], 1 }
 0x1da   :  { %941 = vsyncpa [#allocation5 + $0x1], 1 }
 0x1db   :  { %942 = vsyncmov [#allocation3] }
 0x1de   :  { %s943_s22 = vpop.sfrf %942 }
 0x1df   :  { %p1079_p4 = scmp.ne.s32.totalorder %s943_s22, 0 }
 0x1e1   :  { %947 = shalt.err (%p1079_p4)  }
 0x1e2   :  { %949 = vsyncmov [#allocation3 + $0x1] }
 0x1e5   :  { %s950_s24 = vpop.sfrf %949 }
 0x1e6   :  { %p1080_p8 = scmp.ne.s32.totalorder %s950_s24, 0 }
 0x1e8   :  { %954 = shalt.err (%p1080_p8)  }

</bundles_post_ra>
